<compile_context>
chip_gen: v7x
topology: tpu7x:2x2x1
jax: 0.10.0
libtpu: 0.0.40
codegen_flags: <defaults>
</compile_context>

<pallas_src>
import functools
import math

import jax
import jax.numpy as jnp
from jax.experimental import pallas as pl
from jax.experimental.pallas import tpu as pltpu


def ddpm_schedules(beta1: float, beta2: float, T: int):
    """JAX port of the PyTorch buffer computation (float32, length T+1)."""
    assert 0.0 < beta1 < beta2 < 1.0
    idx = jnp.arange(T + 1, dtype=jnp.float32)
    beta_t = beta1 + (beta2 - beta1) * idx / T
    alpha_t = 1.0 - beta_t
    log_alpha_t = jnp.log(alpha_t)
    alphabar_t = jnp.exp(jnp.cumsum(log_alpha_t))
    return {
        "sqrt_beta_t": jnp.sqrt(beta_t),
        "alpha_t": alpha_t,
        "oneover_sqrta": 1.0 / jnp.sqrt(alpha_t),
        "alphabar_t": alphabar_t,
        "sqrtab": jnp.sqrt(alphabar_t),
        "sqrtmab": jnp.sqrt(1.0 - alphabar_t),
        "mab_over_sqrtmab": (1.0 - alpha_t) / jnp.sqrt(1.0 - alphabar_t),
    }


def _round_up(x: int, m: int) -> int:
    return ((x + m - 1) // m) * m


def _choose_block_rows(N: int, is_v7: bool) -> int:
    # v7x: 64 MiB VMEM + 2 TensorCores -> smaller blocks and >=2 of them so the
    # "parallel" grid axis can shard across both cores.  v5e/v6e: single TC with
    # 128 MiB VMEM -> largest block (per-grid-step overhead is ~0.35 us).
    cap = 1024 if is_v7 else 2048
    min_blocks = 2 if is_v7 else 1
    if N <= 8:
        return N
    return min(cap, _round_up(-(-N // min_blocks), 8))


def ddpm_kernel(cdim, x0_ref, eps_ref, side_ref, w1_ref, wside_ref, w2_ref,
                b2_ref, loss_ref):
    # x0/eps arrive as bf16 (HBM traffic) and are upcast for the f32 q-sample
    # math (v5e has no bf16 VPU/EUP).
    x0 = x0_ref[...].astype(jnp.float32)          # (R, Dp)
    eps = eps_ref[...].astype(jnp.float32)        # (R, Dp)
    s = side_ref[...]                             # (R, C+4): [cond | t/nT | 1 | sqrtab | sqrtmab]

    valid = s[:, cdim + 1:cdim + 2]               # ones column doubles as row-valid mask
    a = s[:, cdim + 2:cdim + 3]                   # sqrtab[t] per row
    b = s[:, cdim + 3:cdim + 4]                   # sqrtmab[t] per row

    # forward diffusion q(x_t | x_0)
    x_t = a * x0 + b * eps                        # (R, Dp) f32

    # epsilon-theta MLP; conditioning, t-embedding and first-layer bias fused
    # into one small matmul: [cond | t/nT | 1 | a | b] @ [wc ; wt ; b1 ; 0 ; 0].
    # All MXU operands bf16 with f32 accumulation.
    pre = jnp.dot(x_t.astype(jnp.bfloat16), w1_ref[...],
                  preferred_element_type=jnp.float32)                 # (R, Hp)
    pre = pre + jnp.dot(s.astype(jnp.bfloat16), wside_ref[...],
                        preferred_element_type=jnp.float32)           # (R, Hp)
    # TODO(synk): on v6e/v7x (bf16 EUP) tanh could run directly in bf16 to skip
    # the separate f32->bf16 pack; kept in f32 for v5e portability.
    h = jnp.tanh(pre)
    eps_pred = jnp.dot(h.astype(jnp.bfloat16), w2_ref[...],
                       preferred_element_type=jnp.float32) + b2_ref[...]  # (R, Dp)

    # per-block partial sum-of-squared-errors, kept per-lane (lane-dense store);
    # padded rows are zeroed by `valid`, padded D lanes are exactly zero.
    diff = (eps - eps_pred) * valid
    col_sse = jnp.sum(diff * diff, axis=0, keepdims=True)             # (1, Dp)
    loss_ref[...] = col_sse[None, :, :]                               # (1, 1, Dp)


def ddpm_forward(x0, cond, t, eps, params, sqrtab, sqrtmab, n_T, *, block_rows=None):
    """Fused DDPM training forward; returns scalar MSE loss (matches nn.MSELoss)."""
    B, S, D = x0.shape
    C = cond.shape[1]
    H = params["w1"].shape[1]
    N = B * S
    f32, bf16 = jnp.float32, jnp.bfloat16

    # lane-dense padded model dims (exact for the loss, see kernel comments)
    Dp = _round_up(D, 128)
    Hp = _round_up(H, 128)

    device_kind = jax.devices()[0].device_kind
    is_v7 = "v7" in device_kind.lower()
    if block_rows is None:
        block_rows = _choose_block_rows(N, is_v7)
    Np = _round_up(N, block_rows)
    num_blocks = Np // block_rows

    # ---- layout plumbing only (zero-padding, reshapes, casts; no model compute) ----
    x0p = jnp.zeros((Np, Dp), bf16).at[:N, :D].set(x0.reshape(N, D).astype(bf16))
    epsp = jnp.zeros((Np, Dp), bf16).at[:N, :D].set(eps.reshape(N, D).astype(bf16))

    # one side-band array per row: [cond | t/nT | 1 | sqrtab[t] | sqrtmab[t]]
    t_norm = (t.astype(f32) / n_T).reshape(B, 1)
    side_b = jnp.concatenate(
        [cond.astype(f32), t_norm, jnp.ones((B, 1), f32),
         sqrtab[t].astype(f32).reshape(B, 1),
         sqrtmab[t].astype(f32).reshape(B, 1)], axis=1)               # (B, C+4)
    side = jnp.zeros((Np, C + 4), f32).at[:N].set(jnp.repeat(side_b, S, axis=0))

    # weights: bf16 MXU operands, zero-padded to lane-dense shapes
    w1 = jnp.zeros((Dp, Hp), bf16).at[:D, :H].set(params["w1"].astype(bf16))
    w_side = (jnp.zeros((C + 4, Hp), bf16)
              .at[:C, :H].set(params["wc"].astype(bf16))
              .at[C, :H].set(params["wt"].astype(bf16)[0])
              .at[C + 1, :H].set(params["b1"].astype(bf16)[0]))       # a/b rows stay 0
    w2 = jnp.zeros((Hp, Dp), bf16).at[:H, :D].set(params["w2"].astype(bf16))
    b2 = jnp.zeros((1, Dp), f32).at[:, :D].set(params["b2"].astype(f32))

    # explicit VMEM budget (double-buffered blocks + resident weights + temporaries)
    est_bytes = (
        2 * 2 * block_rows * Dp * 2                      # x0, eps (bf16, 2 bufs each)
        + 2 * block_rows * (C + 4) * 4                   # side band (f32, 2 bufs)
        + 2 * (Dp * Hp * 2 + (C + 4) * Hp * 2 + Hp * Dp * 2 + Dp * 4)  # weights
        + 2 * 8 * Dp * 4                                 # output tile
        + 8 * block_rows * max(Dp, Hp) * 4               # in-kernel f32/bf16 temps
    )
    vmem_cap = (56 << 20) if is_v7 else (100 << 20)      # v7x has 64 MiB physical
    vmem_limit = int(min(vmem_cap, max(32 << 20, 2 * est_bytes)))

    grid_spec = pltpu.PrefetchScalarGridSpec(
        num_scalar_prefetch=0,
        grid=(num_blocks,),
        in_specs=[
            pl.BlockSpec((block_rows, Dp), lambda i: (i, 0)),      # x0 rows (bf16)
            pl.BlockSpec((block_rows, Dp), lambda i: (i, 0)),      # eps rows (bf16)
            pl.BlockSpec((block_rows, C + 4), lambda i: (i, 0)),   # merged side band
            # constant-index weight blocks (revisited -> fetched once).
            # TODO(synk): pipeline_mode=pl.Buffered(1) would drop their 2nd buffer.
            pl.BlockSpec((Dp, Hp), lambda i: (0, 0)),              # w1 (bf16)
            pl.BlockSpec((C + 4, Hp), lambda i: (0, 0)),           # [wc; wt; b1; 0; 0]
            pl.BlockSpec((Hp, Dp), lambda i: (0, 0)),              # w2 (bf16)
            pl.BlockSpec((1, Dp), lambda i: (0, 0)),               # b2
        ],
        out_specs=pl.BlockSpec((1, 1, Dp), lambda i: (i, 0, 0)),   # per-block partial
    )

    partials = pl.pallas_call(
        functools.partial(ddpm_kernel, C),
        out_shape=jax.ShapeDtypeStruct((num_blocks, 1, Dp), jnp.float32),
        grid_spec=grid_spec,
        compiler_params=pltpu.CompilerParams(
            dimension_semantics=("parallel",),
            vmem_limit_bytes=vmem_limit),
    )(x0p, epsp, side, w1, w_side, w2, b2)

    # reduce partial per-lane sums and normalize in the wrapper
    # (padded lanes/rows contribute exactly zero)
    return jnp.sum(partials) / float(B * S * D)


if __name__ == "__main__":
    key = jax.random.PRNGKey(0)
    B, S, D, C, H = 2, 8, 32, 4, 32
    n_T = 400
    betas = (1e-4, 0.02)

    sched = ddpm_schedules(betas[0], betas[1], n_T)

    k0, k1, k2, k3, kw1, kwc, kwt, kw2 = jax.random.split(key, 8)
    x0 = jax.random.normal(k0, (B, S, D), jnp.float32)
    cond = jax.random.normal(k1, (B, C), jnp.float32)
    t = jax.random.randint(k2, (B,), 1, n_T)          # matches torch.randint(1, n_T, (B,))
    eps = jax.random.normal(k3, (B, S, D), jnp.float32)

    # deterministic "nn_model" parameters (fixed 2-layer MLP epsilon-net)
    params = {
        "w1": jax.random.normal(kw1, (D, H), jnp.float32) / math.sqrt(D),
        "wc": jax.random.normal(kwc, (C, H), jnp.float32) / math.sqrt(C),
        "wt": jax.random.normal(kwt, (1, H), jnp.float32),
        "b1": jnp.zeros((1, H), jnp.float32),
        "w2": jax.random.normal(kw2, (H, D), jnp.float32) / math.sqrt(H),
        "b2": jnp.zeros((1, D), jnp.float32),
    }

    loss = ddpm_forward(x0, cond, t, eps, params,
                        sched["sqrtab"], sched["sqrtmab"], n_T)
    loss = jax.block_until_ready(loss)

    # pure-JAX f32 reference for a correctness sanity check
    a = sched["sqrtab"][t][:, None, None]
    b = sched["sqrtmab"][t][:, None, None]
    x_t = a * x0 + b * eps
    h = jnp.tanh(x_t @ params["w1"]
                 + (cond @ params["wc"])[:, None, :]
                 + (t.astype(jnp.float32) / n_T)[:, None, None] * params["wt"][None]
                 + params["b1"][None])
    eps_pred = h @ params["w2"] + params["b2"][None]
    ref = jnp.mean((eps - eps_pred) ** 2)
    # bf16 inputs / MXU operands with f32 accumulation -> loose tolerance vs f32 ref
    assert jnp.allclose(loss, ref, rtol=5e-2, atol=1e-2), (float(loss), float(ref))

    print("KERNEL_OK")
</pallas_src>

<mosaic_0001>
module attributes {stable_mosaic.version = 11 : i64} {
  func.func @ddpm_kernel(%arg0: i32, %arg1: memref<16x128xbf16, #tpu.memory_space<vmem>>, %arg2: memref<16x128xbf16, #tpu.memory_space<vmem>>, %arg3: memref<16x8xf32, #tpu.memory_space<vmem>>, %arg4: memref<128x128xbf16, #tpu.memory_space<vmem>>, %arg5: memref<8x128xbf16, #tpu.memory_space<vmem>>, %arg6: memref<128x128xbf16, #tpu.memory_space<vmem>>, %arg7: memref<1x128xf32, #tpu.memory_space<vmem>>, %arg8: memref<1x1x128xf32, #tpu.memory_space<vmem>>) attributes {dimension_semantics = [#tpu.dimension_semantics<parallel>], iteration_bounds = array<i64: 1>, scalar_prefetch = 0 : i64, scratch_operands = 0 : i64, tpu.core_type = #tpu.core_type<tc>, window_params = [{transform_indices = @transform_0, window_bounds = array<i64: 16, 128>}, {transform_indices = @transform_1, window_bounds = array<i64: 16, 128>}, {transform_indices = @transform_2, window_bounds = array<i64: 16, 8>}, {pipeline_mode = #tpu.pipeline_mode<synchronous>, transform_indices = @transform_3, window_bounds = array<i64: 128, 128>}, {pipeline_mode = #tpu.pipeline_mode<synchronous>, transform_indices = @transform_4, window_bounds = array<i64: 8, 128>}, {pipeline_mode = #tpu.pipeline_mode<synchronous>, transform_indices = @transform_5, window_bounds = array<i64: 128, 128>}, {pipeline_mode = #tpu.pipeline_mode<synchronous>, transform_indices = @transform_6, window_bounds = array<i64: 1, 128>}, {transform_indices = @transform_7, window_bounds = array<i64: 1, 1, 128>}]} {
    %c0 = arith.constant 0 : index
    %c0_0 = arith.constant 0 : index
    %0 = vector.load %arg1[%c0, %c0_0] : memref<16x128xbf16, #tpu.memory_space<vmem>>, vector<16x128xbf16>
    %1 = arith.extf %0 : vector<16x128xbf16> to vector<16x128xf32>
    %c0_1 = arith.constant 0 : index
    %c0_2 = arith.constant 0 : index
    %2 = vector.load %arg2[%c0_1, %c0_2] : memref<16x128xbf16, #tpu.memory_space<vmem>>, vector<16x128xbf16>
    %3 = arith.extf %2 : vector<16x128xbf16> to vector<16x128xf32>
    %c0_3 = arith.constant 0 : index
    %c0_4 = arith.constant 0 : index
    %4 = vector.load %arg3[%c0_3, %c0_4] : memref<16x8xf32, #tpu.memory_space<vmem>>, vector<16x8xf32>
    %5 = vector.extract_strided_slice %4 {offsets = [0, 5], sizes = [16, 1], strides = [1, 1]} : vector<16x8xf32> to vector<16x1xf32>
    %6 = vector.extract_strided_slice %4 {offsets = [0, 6], sizes = [16, 1], strides = [1, 1]} : vector<16x8xf32> to vector<16x1xf32>
    %7 = vector.extract_strided_slice %4 {offsets = [0, 7], sizes = [16, 1], strides = [1, 1]} : vector<16x8xf32> to vector<16x1xf32>
    %8 = vector.broadcast %6 : vector<16x1xf32> to vector<16x128xf32>
    %9 = arith.mulf %8, %1 : vector<16x128xf32>
    %10 = vector.broadcast %7 : vector<16x1xf32> to vector<16x128xf32>
    %11 = arith.mulf %10, %3 : vector<16x128xf32>
    %12 = arith.addf %9, %11 : vector<16x128xf32>
    %13 = arith.truncf %12 : vector<16x128xf32> to vector<16x128xbf16>
    %c0_5 = arith.constant 0 : index
    %c0_6 = arith.constant 0 : index
    %14 = vector.load %arg4[%c0_5, %c0_6] : memref<128x128xbf16, #tpu.memory_space<vmem>>, vector<128x128xbf16>
    %cst = arith.constant dense<0.000000e+00> : vector<16x128xf32>
    %15 = tpu.matmul %13, %14, %cst {dimension_numbers = #tpu.dot_dimension_numbers<[1], [0], [0], [1], [0, 0, 1, 1], [], []>} : vector<16x128xbf16>, vector<128x128xbf16>, vector<16x128xf32> -> vector<16x128xf32>
    %16 = arith.truncf %4 : vector<16x8xf32> to vector<16x8xbf16>
    %c0_7 = arith.constant 0 : index
    %c0_8 = arith.constant 0 : index
    %17 = vector.load %arg5[%c0_7, %c0_8] : memref<8x128xbf16, #tpu.memory_space<vmem>>, vector<8x128xbf16>
    %cst_9 = arith.constant dense<0.000000e+00> : vector<16x128xf32>
    %18 = tpu.matmul %16, %17, %cst_9 {dimension_numbers = #tpu.dot_dimension_numbers<[1], [0], [0], [1], [0, 0, 1, 1], [], []>} : vector<16x8xbf16>, vector<8x128xbf16>, vector<16x128xf32> -> vector<16x128xf32>
    %19 = arith.addf %15, %18 : vector<16x128xf32>
    %20 = math.tanh %19 : vector<16x128xf32>
    %21 = arith.truncf %20 : vector<16x128xf32> to vector<16x128xbf16>
    %c0_10 = arith.constant 0 : index
    %c0_11 = arith.constant 0 : index
    %22 = vector.load %arg6[%c0_10, %c0_11] : memref<128x128xbf16, #tpu.memory_space<vmem>>, vector<128x128xbf16>
    %cst_12 = arith.constant dense<0.000000e+00> : vector<16x128xf32>
    %23 = tpu.matmul %21, %22, %cst_12 {dimension_numbers = #tpu.dot_dimension_numbers<[1], [0], [0], [1], [0, 0, 1, 1], [], []>} : vector<16x128xbf16>, vector<128x128xbf16>, vector<16x128xf32> -> vector<16x128xf32>
    %c0_13 = arith.constant 0 : index
    %c0_14 = arith.constant 0 : index
    %24 = vector.load %arg7[%c0_13, %c0_14] : memref<1x128xf32, #tpu.memory_space<vmem>>, vector<1x128xf32>
    %25 = vector.broadcast %24 : vector<1x128xf32> to vector<16x128xf32>
    %26 = arith.addf %23, %25 : vector<16x128xf32>
    %27 = arith.subf %3, %26 : vector<16x128xf32>
    %28 = vector.broadcast %5 : vector<16x1xf32> to vector<16x128xf32>
    %29 = arith.mulf %27, %28 : vector<16x128xf32>
    %30 = arith.mulf %29, %29 : vector<16x128xf32>
    %cst_15 = arith.constant dense<0.000000e+00> : vector<128xf32>
    %31 = vector.multi_reduction <add>, %30, %cst_15 [0] : vector<16x128xf32> to vector<128xf32>
    %32 = vector.shape_cast %31 : vector<128xf32> to vector<1x128xf32>
    %33 = vector.shape_cast %32 : vector<1x128xf32> to vector<1x1x128xf32>
    %c0_16 = arith.constant 0 : index
    %c0_17 = arith.constant 0 : index
    %c0_18 = arith.constant 0 : index
    %34 = vector.load %arg8[%c0_16, %c0_17, %c0_18] : memref<1x1x128xf32, #tpu.memory_space<vmem>>, vector<1x1x128xf32>
    tpu.vector_store %arg8[%c0_16, %c0_17, %c0_18], %33 {strides = array<i32>} : memref<1x1x128xf32, #tpu.memory_space<vmem>>, vector<1x1x128xf32>,
    return
  }
  func.func @transform_0(%arg0: i32) -> (i32, i32) {
    %c0_i32 = arith.constant 0 : i32
    %c0_i32_0 = arith.constant 0 : i32
    return %arg0, %c0_i32 : i32, i32
  }
  func.func @transform_1(%arg0: i32) -> (i32, i32) {
    %c0_i32 = arith.constant 0 : i32
    %c0_i32_0 = arith.constant 0 : i32
    return %arg0, %c0_i32 : i32, i32
  }
  func.func @transform_2(%arg0: i32) -> (i32, i32) {
    %c0_i32 = arith.constant 0 : i32
    %c0_i32_0 = arith.constant 0 : i32
    return %arg0, %c0_i32 : i32, i32
  }
  func.func @transform_3(%arg0: i32) -> (i32, i32) {
    %c0_i32 = arith.constant 0 : i32
    %c0_i32_0 = arith.constant 0 : i32
    %c0_i32_1 = arith.constant 0 : i32
    return %c0_i32, %c0_i32_0 : i32, i32
  }
  func.func @transform_4(%arg0: i32) -> (i32, i32) {
    %c0_i32 = arith.constant 0 : i32
    %c0_i32_0 = arith.constant 0 : i32
    %c0_i32_1 = arith.constant 0 : i32
    return %c0_i32, %c0_i32_0 : i32, i32
  }
  func.func @transform_5(%arg0: i32) -> (i32, i32) {
    %c0_i32 = arith.constant 0 : i32
    %c0_i32_0 = arith.constant 0 : i32
    %c0_i32_1 = arith.constant 0 : i32
    return %c0_i32, %c0_i32_0 : i32, i32
  }
  func.func @transform_6(%arg0: i32) -> (i32, i32) {
    %c0_i32 = arith.constant 0 : i32
    %c0_i32_0 = arith.constant 0 : i32
    %c0_i32_1 = arith.constant 0 : i32
    return %c0_i32, %c0_i32_0 : i32, i32
  }
  func.func @transform_7(%arg0: i32) -> (i32, i32, i32) {
    %c0_i32 = arith.constant 0 : i32
    %c0_i32_0 = arith.constant 0 : i32
    %c0_i32_1 = arith.constant 0 : i32
    return %arg0, %c0_i32, %c0_i32_0 : i32, i32, i32
  }
}

</mosaic_0001>

<bundles_post_ra>
// kernel: tpu_custom_call.1
= control target key start
LH: loop header
LB: loop body
LE: loop exit
PB: predicated region body
PF: predicated region fallthrough
CT: control target
= control target key end

     0   :  { %12 = vsyncpa [#allocation3], 0  ;;  %s741_s0 = inlined_call_operand.vmem [shape: bf16[16,128], index: 0, kind: input, shape index: {}]   ;;  %s742_s1 = inlined_call_operand.vmem [shape: bf16[16,128], index: 1, kind: input, shape index: {}]   ;;  %s743_s2 = inlined_call_operand.vmem [shape: f32[16,8], index: 2, kind: input, shape index: {}]   ;;  %s744_s3 = inlined_call_operand.hbm [shape: bf16[128,128], index: 3, kind: input, shape index: {}]   ;;  %s745_s4 = inlined_call_operand.vmem [shape: bf16[8,128], index: 4, kind: input, shape index: {}]   ;;  %s746_s5 = inlined_call_operand.hbm [shape: bf16[128,128], index: 5, kind: input, shape index: {}]   ;;  %s747_s6 = inlined_call_operand.vmem [shape: f32[1,128], index: 6, kind: input, shape index: {}]   ;;  %s748_s7 = inlined_call_operand.hbm [shape: f32[1,1,128], index: 7, kind: output, shape index: {}]  }
   0x1   :  { %13 = vsyncpa [#allocation6], 0 }
   0x2   :  { %14 = vsyncpa [#allocation4], 0  ;;  %s602_s24 = smov [#allocation2]   ;;  %s530_s28 = scalar_lea.hbm %s744_s3, 1024 }
   0x3   :  { %s26_s25 = sshll.u32 %s602_s24, 4  ;;  %p531_p0 = scmp.ne.s32.totalorder %s744_s3, %s530_s28  ;;  %s27_s25 = int_to_ptr.vmem [resolvable:$true] %s26_s25 }
   0x4   :  { %p534_p1 = scmp.lt.u32.totalorder %s530_s28, %s744_s3 }
   0x6   :  { %p536_p2 = pnand %p534_p1, %p531_p0 }
   0x8   :  { %539 = shalt.err (!%p536_p2)
}
   0x9   :  { %s540_s10 = scalar_lea.vmem %s27_s25, 1024  ;;  %p545_p4 = scmp.lt.s32.totalorder %s27_s25, %s27_s25 }
   0xa   :  { %p541_p3 = scmp.ne.s32.totalorder %s27_s25, %s540_s10  ;;  %p546_p5 = scmp.lt.s32.totalorder %s540_s10, %s540_s10 }
   0xc   :  { %p547_p6 = por %p546_p5, %p545_p4 }
   0xe   :  { %p548_p7 = pnand %p547_p6, %p541_p3 }
  0x10   :  { %551 = shalt.err (!%p548_p7)
}
  0x11   :  { %s603_s11 = smov 64   ;;  %s604_s12 = smov 4  }
  0x12   :  { %32 = dma.hbm_to_vmem [thread:$0]  %s744_s3, 1024, %s27_s25, [#allocation3], %s603_s11, %s603_s11, %s604_s12  }
  0x13   :  { %s605_s15 = smov [#allocation5]   ;;  %s552_s19 = scalar_lea.hbm %s746_s5, 1024 }
  0x14   :  { %s40_s16 = sshll.u32 %s605_s15, 4  ;;  %p553_p8 = scmp.ne.s32.totalorder %s746_s5, %s552_s19  ;;  %s41_s16 = int_to_ptr.vmem [resolvable:$true] %s40_s16 }
  0x15   :  { %p556_p9 = scmp.lt.u32.totalorder %s552_s19, %s746_s5 }
  0x17   :  { %p558_p10 = pnand %p556_p9, %p553_p8 }
  0x19   :  { %561 = shalt.err (!%p558_p10)
}
  0x1a   :  { %s562_s24 = scalar_lea.vmem %s41_s16, 1024  ;;  %p567_p12 = scmp.lt.s32.totalorder %s41_s16, %s41_s16 }
  0x1b   :  { %p563_p11 = scmp.ne.s32.totalorder %s41_s16, %s562_s24  ;;  %p568_p13 = scmp.lt.s32.totalorder %s562_s24, %s562_s24 }
  0x1d   :  { %p569_p0 = por %p568_p13, %p567_p12 }
  0x1f   :  { %p570_p1 = pnand %p569_p0, %p563_p11 }
  0x21   :  { %573 = shalt.err (!%p570_p1)
}
  0x22   :  { %46 = dma.hbm_to_vmem [thread:$0]  %s746_s5, 1024, %s41_s16, [#allocation6], %s603_s11, %s603_s11, %s604_s12  }
  0x23   :  { %596 = dma.done.wait [#allocation3], 1024  }
  0x24   :  { %597 = vsyncadd [#allocation3], 4294966272 }
  0x25   :  { %598 = dma.done.wait [#allocation6], 1024  }
  0x26   :  { %599 = vsyncadd [#allocation6], 4294966272  ;;  %v606_v0 = vmov 7   ;;  %v607_v1 = vmov 6   ;;  %v608_v2 = vmov 0.0   ;;  %vm609_vm0 = vmmov 0  }
  0x27   :  { %507 = vset.pattern.permute.xlu1 %v606_v0  ;;  %506 = vset.pattern.permute.xlu0 %v607_v1  ;;  %vm113_vm1 = vcmask 1043456   ;;  %v685_v3 = vld [vmem:[%s743_s2] sm:$0xff]  ;;  %v695_v5 = vld [vmem:[%s743_s2 + $0x8] sm:$0xff]  ;;  %vm109_vm2 = vcmask 64512   ;;  %v512_v10 = vld [vmem:[#allocation2 + $0x10] sm:$0xff]   ;;  %v610_v41 = vmov 5  }
  0x28   :  { %446 = vmatprep.subr.bf16.mxu0 %v608_v2  ;;  %448 = vmatprep.mubr.msk.bf16.mxu0 %vm609_vm0, %v608_v2  ;;  %v108_v4 = vld [vmem:[%s745_s4] sm:$0xf]  ;;  %v107_v7 = vpack.c.bf16 %v695_v5, %v685_v3  ;;  %v511_v9 = vld [vmem:[#allocation2 + $0x8] sm:$0xff]   ;;  %v513_v12 = vld [vmem:[#allocation2 + $0x18] sm:$0xff]  }
  0x29   :  { %472 = vmatprep.subr.bf16.mxu1 %v608_v2  ;;  %488 = vmatprep.mubr.msk.bf16.mxu1 %vm609_vm0, %v608_v2  ;;  %v115_v6 = vsel %vm113_vm1, %v108_v4, 0  ;;  %v510_v8 = vld [vmem:[#allocation2] sm:$0xff]   ;;  %v519_v13 = vld [vmem:[#allocation5 + $0x8] sm:$0xff]   ;;  %v520_v14 = vld [vmem:[#allocation5 + $0x10] sm:$0xff]  }
  0x2a   :  { %79 = vperm.xlu1 %507, %v685_v3   ;;  %68 = vperm.xlu0 %506, %v685_v3   ;;  %v518_v11 = vld [vmem:[#allocation5] sm:$0xff]   ;;  %v521_v16 = vld [vmem:[#allocation5 + $0x18] sm:$0xff]   ;;  %v515_v17 = vld [vmem:[#allocation2 + $0x28] sm:$0xff]  }
  0x2b   :  { %447 = vmatpush3.bf16.msra.mxu0 %v115_v6  ;;  %473 = vmatpush3.bf16.msra.mxu1 %v518_v11  ;;  %v514_v15 = vld [vmem:[#allocation2 + $0x20] sm:$0xff]   ;;  %v516_v18 = vld [vmem:[#allocation2 + $0x30] sm:$0xff]   ;;  %v517_v19 = vld [vmem:[#allocation2 + $0x38] sm:$0xff]  }
  0x2c   :  { %452 = vmatprep.subr.bf16.mxu0 %v608_v2  ;;  %474 = vmatprep.subr.bf16.mxu1 %v608_v2  ;;  %v423_v20 = vld [vmem:[%s742_s1] sm:$0xff]   ;;  %v523_v38 = vld [vmem:[#allocation5 + $0x28] sm:$0xff]   ;;  %v524_v39 = vld [vmem:[#allocation5 + $0x30] sm:$0xff]  }
  0x2d   :  { %v419_v21 = vld [vmem:[%s741_s0] sm:$0xff]   ;;  %v424_v22 = vunpack.c.l.bf16 %v423_v20  ;;  %v425_v26 = vunpack.c.h.bf16 %v423_v20  ;;  %v525_v40 = vld [vmem:[#allocation5 + $0x38] sm:$0xff]  }
  0x2e   :  { %83 = vperm.xlu1 %507, %v695_v5   ;;  %73 = vperm.xlu0 %506, %v695_v5   ;;  %v420_v23 = vunpack.c.l.bf16 %v419_v21  ;;  %v421_v27 = vunpack.c.h.bf16 %v419_v21  ;;  %v522_v37 = vld [vmem:[#allocation5 + $0x20] sm:$0xff]  }
  0x2f   :  { %449 = vmatmul.mubr.msk.bf16.vlgmr.msra.gmra.mrb[0].mxu0 %vm109_vm2, %v107_v7  ;;  %475 = vmatpush3.bf16.msra.mxu1 %v519_v13  ;;  %v409_v49 = vld [vmem:[%s747_s6] ss:$0 sm:$0xff]  ;;  %s611_s6 = smov [#allocation7]  }
  0x30   :  { %453 = vmatpush3.bf16.msra.mxu0 %v510_v8  ;;  %468 = vmatprep.mubr.msk.bf16.mxu0 %vm609_vm0, %v608_v2  ;;  %s390_s10 = sshll.u32 %s611_s6, 4  ;;  %s391_s10 = int_to_ptr.vmem [resolvable:$true] %s390_s10 }
  0x31   :  { %454 = vmatprep.subr.bf16.mxu0 %v608_v2  ;;  %476 = vmatprep.subr.bf16.mxu1 %v608_v2  ;;  %s574_s11 = scalar_lea.vmem %s391_s10, 16  ;;  %s578_s12 = scalar_lea.vmem %s391_s10, 32 }
  0x32   :  { %508 = vset.pattern.permute.xlu0 %v610_v41  ;;  %509 = vset.pattern.permute.xlu1 %v610_v41  ;;  %p575_p2 = scmp.ne.s32.totalorder %s391_s10, %s574_s11  ;;  %p579_p3 = scmp.lt.s32.totalorder %s391_s10, %s391_s10 }
  0x33   :  { %477 = vmatpush3.bf16.msra.mxu1 %v520_v14  ;;  %365 = vperm.xlu0 %508, %v685_v3   ;;  %p580_p4 = scmp.lt.s32.totalorder %s578_s12, %s574_s11 }
  0x34   :  { %455 = vmatpush3.bf16.msra.mxu0 %v511_v9  ;;  %478 = vmatprep.subr.bf16.mxu1 %v608_v2 }
  0x35   :  { %456 = vmatprep.subr.bf16.mxu0 %v608_v2  ;;  %369 = vperm.xlu1 %509, %v695_v5   ;;  %p581_p5 = por %p580_p4, %p579_p3 }
  0x37   :  { %479 = vmatpush3.bf16.msra.mxu1 %v521_v16  ;;  %p582_p6 = pnand %p581_p5, %p575_p2 }
  0x38   :  { %457 = vmatpush3.bf16.msra.mxu0 %v512_v10  ;;  %480 = vmatprep.subr.bf16.mxu1 %v608_v2 }
  0x39   :  { %458 = vmatprep.subr.bf16.mxu0 %v608_v2 }
  0x3b   :  { %481 = vmatpush3.bf16.msra.mxu1 %v522_v37 }
  0x3c   :  { %459 = vmatpush3.bf16.msra.mxu0 %v513_v12  ;;  %482 = vmatprep.subr.bf16.mxu1 %v608_v2 }
  0x3d   :  { %460 = vmatprep.subr.bf16.mxu0 %v608_v2 }
  0x3f   :  { %483 = vmatpush3.bf16.msra.mxu1 %v523_v38 }
  0x40   :  { %461 = vmatpush3.bf16.msra.mxu0 %v514_v15  ;;  %484 = vmatprep.subr.bf16.mxu1 %v608_v2 }
  0x41   :  { %462 = vmatprep.subr.bf16.mxu0 %v608_v2 }
  0x43   :  { %485 = vmatpush3.bf16.msra.mxu1 %v524_v39 }
  0x44   :  { %463 = vmatpush3.bf16.msra.mxu0 %v515_v17  ;;  %486 = vmatprep.subr.bf16.mxu1 %v608_v2 }
  0x45   :  { %464 = vmatprep.subr.bf16.mxu0 %v608_v2 }
  0x47   :  { %487 = vmatpush3.bf16.msra.mxu1 %v525_v40 }
  0x48   :  { %465 = vmatpush3.bf16.msra.mxu0 %v516_v18 }
  0x49   :  { %466 = vmatprep.subr.bf16.mxu0 %v608_v2 }
  0x4c   :  { %467 = vmatpush3.bf16.msra.mxu0 %v517_v19 }
  0xa9   :  { %v80_v24 = vpop.permute.xlu1 %79  ;;  %v69_v25 = vpop.permute.xlu0 %68 }
  0xaa   :  { %v86_v28 = vmul.f32 %v424_v22, %v80_v24  ;;  %v76_v29 = vmul.f32 %v420_v23, %v69_v25 }
  0xac   :  { %v88_v34 = vadd.f32 %v86_v28, %v76_v29 }
  0xad   :  { %v84_v30 = vpop.permute.xlu1 %83  ;;  %v74_v31 = vpop.permute.xlu0 %73 }
  0xae   :  { %v87_v32 = vmul.f32 %v425_v26, %v84_v30  ;;  %v77_v33 = vmul.f32 %v421_v27, %v74_v31 }
  0xb0   :  { %v89_v35 = vadd.f32 %v87_v32, %v77_v33 }
  0xb2   :  { %v90_v36 = vpack.c.bf16 %v89_v35, %v88_v34  ;;  %v366_v54 = vpop.permute.xlu0 %365 }
  0xb4   :  { %469 = vmatmul.mubr.bf16.vlgmr.msra.gmra.mrb[0].mxu0 %v90_v36  ;;  %v370_v58 = vpop.permute.xlu1 %369 }
 0x187   :  { %v240_v42 = vpop.f32.mrb[0].mxu0 }
 0x188   :  { %v470_v43 = vpop.f32.mrb[1].mxu0  ;;  %526 = vtanh.f32 %v240_v42 }
 0x189   :  { %v243_v44 = vpop.f32.mrb[2].mxu0 }
 0x18a   :  { %528 = vtanh.f32 %v243_v44  ;;  %v471_v45 = vpop.f32.mrb[3].mxu0 }
 0x192   :  { %v527_v46 = vpop.eup %526 }
 0x194   :  { %v529_v47 = vpop.eup %528 }
 0x195   :  { %v249_v48 = vpack.c.bf16 %v529_v47, %v527_v46 }
 0x197   :  { %489 = vmatmul.mubr.bf16.vlgmr.msra.gmra.mrb[0].mxu1 %v249_v48 }
 0x26a   :  { %v355_v50 = vpop.f32.mrb[0].mxu1 }
 0x26b   :  { %v356_v51 = vadd.f32 %v409_v49, %v355_v50  ;;  %v490_v52 = vpop.f32.mrb[1].mxu1 }
 0x26c   :  { %v358_v53 = vpop.f32.mrb[2].mxu1 }
 0x26d   :  { %v359_v55 = vadd.f32 %v409_v49, %v358_v53  ;;  %v491_v56 = vpop.f32.mrb[3].mxu1  ;;  %v362_v57 = vsub.f32 %v424_v22, %v356_v51 }
 0x26f   :  { %v372_v59 = vmul.f32 %v366_v54, %v362_v57  ;;  %v363_v60 = vsub.f32 %v425_v26, %v359_v55 }
 0x271   :  { %v373_v61 = vmul.f32 %v370_v58, %v363_v60  ;;  %v374_v62 = vmul.f32 %v372_v59, %v372_v59 }
 0x273   :  { %v375_v63 = vmul.f32 %v373_v61, %v373_v61 }
 0x275   :  { %v376_v0 = vadd.f32 %v375_v63, %v374_v62 }
 0x277   :  { %v377_v1 = vrot.slane %v376_v0, 4 }
 0x279   :  { %v378_v2 = vadd.f32 %v377_v1, %v376_v0 }
 0x27b   :  { %v379_v3 = vrot.slane %v378_v2, 2 }
 0x27d   :  { %v380_v4 = vadd.f32 %v379_v3, %v378_v2 }
 0x27f   :  { %v381_v5 = vrot.slane %v380_v4, 1 }
 0x281   :  { %v382_v6 = vadd.f32 %v381_v5, %v380_v4 }
 0x283   :  { %383 = vst [vmem:[#allocation7] sm:$0x1] %v382_v6 }
 0x284   :  { %585 = shalt.err (!%p582_p6)
}
 0x285   :  { %s586_s15 = scalar_lea.hbm %s748_s7, 16 }
 0x286   :  { %p587_p7 = scmp.ne.s32.totalorder %s748_s7, %s586_s15  ;;  %p590_p8 = scmp.lt.u32.totalorder %s586_s15, %s748_s7 }
 0x288   :  { %p592_p9 = pnand %p590_p8, %p587_p7 }
 0x28a   :  { %595 = shalt.err (!%p592_p9)
}
 0x28b   :  { %393 = dma.vmem_to_hbm [thread:$0]  %s391_s10, 16, %s748_s7, [#allocation4]  }
 0x28c   :  { %600 = dma.done.wait [#allocation4], 16  }
 0x28d   :  { %601 = vsyncadd [#allocation4], 4294967280 }
 0x28e   :  { %397 = vsyncpa [#allocation3], 1 }
 0x28f   :  { %398 = vsyncpa [#allocation6], 1 }
 0x290   :  { %399 = vsyncpa [#allocation4], 1 }

</bundles_post_ra>
